<compile_context>
chip_gen: v6e
topology: v6e:2x2x1
jax: 0.10.0
libtpu: 0.0.40
codegen_flags: <defaults>
</compile_context>

<pallas_src>
import math
import jax
import jax.numpy as jnp
from jax.experimental import pallas as pl
from jax.experimental.pallas import tpu as pltpu


def _round_up(x, m):
    return ((x + m - 1) // m) * m


def _make_kernel(K, PAD, OFF, TS, TD, NT):
    def kernel(x_ref, w_ref, b_ref, out_ref, ext_ref, carry_ref):
        # x_ref:   (1, TS, TD)  current (batch, time-tile, channel-tile) of input
        # w_ref:   (K, TD)      depthwise taps for this channel tile
        # b_ref:   (1, TD)      bias for this channel tile
        # out_ref: (1, TS, TD)
        # ext_ref:   (TS + OFF, TD) scratch: [ ..., halo(PAD rows), current tile(TS rows) ]
        # carry_ref: (max(PAD,1), TD) persistent scratch: last PAD rows of previous tile
        s = pl.program_id(2)

        if PAD > 0:
            @pl.when(s == 0)
            def _init():
                # first time tile of this (batch, channel-block): causal zeros
                carry_ref[...] = jnp.zeros_like(carry_ref)

            # halo rows (previous PAD timesteps)
            ext_ref[OFF - PAD:OFF, :] = carry_ref[...]

        # current tile at sublane-aligned offset OFF
        ext_ref[OFF:OFF + TS, :] = x_ref[0, :, :]

        if PAD > 0 and NT > 1:
            # save halo for the next time tile of this (batch, channel-block)
            carry_ref[...] = x_ref[0, TS - PAD:TS, :]

        # y[t] = bias + sum_k w[k] * ext_window[t + k]; static unroll over K taps,
        # each tap is a full-width (TS, TD) VPU multiply-add.
        acc = jnp.broadcast_to(b_ref[...], (TS, TD)).astype(jnp.float32)
        for k in range(K):
            lo = OFF - PAD + k
            acc = acc + w_ref[k:k + 1, :] * ext_ref[lo:lo + TS, :]

        out_ref[0, :, :] = acc.astype(out_ref.dtype)

    return kernel


def causal_conv1d(x, weight, bias=None):
    """Causal depthwise Conv1d (groups = dim).

    x:      (B, T, D) float
    weight: (D, K)    depthwise taps (== PyTorch conv.weight[:, 0, :])
    bias:   (D,) or None
    returns (B, T, D):  y[:, t] = bias + sum_k weight[:, k] * x[:, t + k - (K-1)]
    """
    B, T, D = x.shape
    Dw, K = weight.shape
    assert Dw == D
    PAD = K - 1
    if bias is None:
        bias = jnp.zeros((D,), x.dtype)

    # lane-dense channel padding (multiple of 128)
    Dp = _round_up(D, 128)
    # time tiling: single tile for short sequences, 512-row tiles otherwise
    TS = T if T <= 1024 else 512
    Tp = _round_up(T, TS)
    NT = Tp // TS
    # channel tiling: one block if it is small, else 128-wide blocks (parallel axis)
    TD = Dp if Dp <= 512 else 128
    ND = Dp // TD
    # sublane-aligned offset for the current tile inside the extended scratch
    OFF = _round_up(PAD, 8) if PAD > 0 else 0

    xf = x.astype(jnp.float32)
    x_p = jnp.pad(xf, ((0, 0), (0, Tp - T), (0, Dp - D)))                     # (B, Tp, Dp)
    w_p = jnp.pad(weight.astype(jnp.float32).T, ((0, 0), (0, Dp - D)))        # (K, Dp)
    b_p = jnp.pad(bias.astype(jnp.float32).reshape(1, D), ((0, 0), (0, Dp - D)))  # (1, Dp)

    kernel = _make_kernel(K, PAD, OFF, TS, TD, NT)

    out = pl.pallas_call(
        kernel,
        out_shape=jax.ShapeDtypeStruct((B, Tp, Dp), jnp.float32),
        grid_spec=pltpu.PrefetchScalarGridSpec(
            num_scalar_prefetch=0,
            grid=(B, ND, NT),
            in_specs=[
                pl.BlockSpec((1, TS, TD), lambda b, d, s: (b, s, d)),
                pl.BlockSpec((K, TD), lambda b, d, s: (0, d)),
                pl.BlockSpec((1, TD), lambda b, d, s: (0, d)),
            ],
            out_specs=pl.BlockSpec((1, TS, TD), lambda b, d, s: (b, s, d)),
            scratch_shapes=[
                pltpu.VMEM((TS + OFF, TD), jnp.float32),
                pltpu.VMEM((max(PAD, 1), TD), jnp.float32),
            ],
        ),
        compiler_params=pltpu.CompilerParams(
            dimension_semantics=("parallel", "parallel", "arbitrary")),
    )(x_p, w_p, b_p)

    return out[:, :T, :D].astype(x.dtype)


def causal_conv1d_reference(x, weight, bias=None):
    """Pure-JAX reference matching the PyTorch CausalConv1d forward."""
    B, T, D = x.shape
    K = weight.shape[1]
    if bias is None:
        bias = jnp.zeros((D,), x.dtype)
    x_pad = jnp.pad(x.astype(jnp.float32), ((0, 0), (K - 1, 0), (0, 0)))
    y = jnp.broadcast_to(bias.astype(jnp.float32)[None, None, :], (B, T, D))
    for k in range(K):
        y = y + weight[:, k].astype(jnp.float32)[None, None, :] * x_pad[:, k:k + T, :]
    return y


if __name__ == "__main__":
    B, T, D, K = 2, 16, 32, 4
    key = jax.random.PRNGKey(0)
    kx, kw, kb = jax.random.split(key, 3)

    x = jax.random.normal(kx, (B, T, D), dtype=jnp.float32)

    # PyTorch Conv1d default init: U(-bound, bound), bound = 1/sqrt(fan_in), fan_in = K (depthwise)
    bound = 1.0 / math.sqrt(K)
    weight = jax.random.uniform(kw, (D, K), minval=-bound, maxval=bound, dtype=jnp.float32)
    bias = jax.random.uniform(kb, (D,), minval=-bound, maxval=bound, dtype=jnp.float32)

    out = jax.jit(causal_conv1d)(x, weight, bias)
    out = jax.block_until_ready(out)

    ref = causal_conv1d_reference(x, weight, bias)
    assert out.shape == (B, T, D)
    assert jnp.allclose(out, ref, rtol=1e-5, atol=1e-5), "mismatch vs reference"

    print("KERNEL_OK")
</pallas_src>

<mosaic_0001>
module attributes {stable_mosaic.version = 11 : i64} {
  func.func @kernel(%arg0: i32, %arg1: i32, %arg2: i32, %arg3: memref<1x16x128xf32, #tpu.memory_space<vmem>>, %arg4: memref<4x128xf32, #tpu.memory_space<vmem>>, %arg5: memref<1x128xf32, #tpu.memory_space<vmem>>, %arg6: memref<1x16x128xf32, #tpu.memory_space<vmem>>, %arg7: memref<24x128xf32, #tpu.memory_space<vmem>>, %arg8: memref<3x128xf32, #tpu.memory_space<vmem>>) attributes {dimension_semantics = [#tpu.dimension_semantics<parallel>, #tpu.dimension_semantics<parallel>, #tpu.dimension_semantics<arbitrary>], iteration_bounds = array<i64: 2, 1, 1>, scalar_prefetch = 0 : i64, scratch_operands = 2 : i64, tpu.core_type = #tpu.core_type<tc>, window_params = [{transform_indices = @transform_0, window_bounds = array<i64: 1, 16, 128>}, {transform_indices = @transform_1, window_bounds = array<i64: 4, 128>}, {transform_indices = @transform_2, window_bounds = array<i64: 1, 128>}, {transform_indices = @transform_3, window_bounds = array<i64: 1, 16, 128>}]} {
    %c0_i32 = arith.constant 0 : i32
    %0 = arith.cmpi eq, %arg2, %c0_i32 : i32
    %1 = arith.extui %0 : i1 to i32
    %c0_i32_0 = arith.constant 0 : i32
    %2 = arith.cmpi ne, %1, %c0_i32_0 : i32
    scf.if %2 {
      %cst = arith.constant 0.000000e+00 : f32
      %34 = vector.broadcast %cst : f32 to vector<3x128xf32>
      %c0_23 = arith.constant 0 : index
      %c0_24 = arith.constant 0 : index
      %35 = vector.load %arg8[%c0_23, %c0_24] : memref<3x128xf32, #tpu.memory_space<vmem>>, vector<3x128xf32>
      tpu.vector_store %arg8[%c0_23, %c0_24], %34 {strides = array<i32>} : memref<3x128xf32, #tpu.memory_space<vmem>>, vector<3x128xf32>,
    } else {
    }
    %c0 = arith.constant 0 : index
    %c0_1 = arith.constant 0 : index
    %3 = vector.load %arg8[%c0, %c0_1] : memref<3x128xf32, #tpu.memory_space<vmem>>, vector<3x128xf32>
    %c5 = arith.constant 5 : index
    %c0_2 = arith.constant 0 : index
    %4 = vector.load %arg7[%c5, %c0_2] : memref<24x128xf32, #tpu.memory_space<vmem>>, vector<3x128xf32>
    tpu.vector_store %arg7[%c5, %c0_2], %3 {strides = array<i32>} : memref<24x128xf32, #tpu.memory_space<vmem>>, vector<3x128xf32>,
    %c0_3 = arith.constant 0 : index
    %c0_4 = arith.constant 0 : index
    %c0_5 = arith.constant 0 : index
    %5 = vector.load %arg3[%c0_3, %c0_4, %c0_5] : memref<1x16x128xf32, #tpu.memory_space<vmem>>, vector<1x16x128xf32>
    %6 = vector.shape_cast %5 : vector<1x16x128xf32> to vector<16x128xf32>
    %c8 = arith.constant 8 : index
    %c0_6 = arith.constant 0 : index
    %7 = vector.load %arg7[%c8, %c0_6] : memref<24x128xf32, #tpu.memory_space<vmem>>, vector<16x128xf32>
    tpu.vector_store %arg7[%c8, %c0_6], %6 {strides = array<i32>} : memref<24x128xf32, #tpu.memory_space<vmem>>, vector<16x128xf32>,
    %c0_7 = arith.constant 0 : index
    %c0_8 = arith.constant 0 : index
    %8 = vector.load %arg5[%c0_7, %c0_8] : memref<1x128xf32, #tpu.memory_space<vmem>>, vector<1x128xf32>
    %9 = vector.shape_cast %8 : vector<1x128xf32> to vector<1x128xf32>
    %10 = vector.broadcast %9 : vector<1x128xf32> to vector<16x128xf32>
    %c0_9 = arith.constant 0 : index
    %c0_10 = arith.constant 0 : index
    %11 = vector.load %arg4[%c0_9, %c0_10] : memref<4x128xf32, #tpu.memory_space<vmem>>, vector<1x128xf32>
    %c5_11 = arith.constant 5 : index
    %c0_12 = arith.constant 0 : index
    %12 = vector.load %arg7[%c5_11, %c0_12] : memref<24x128xf32, #tpu.memory_space<vmem>>, vector<16x128xf32>
    %13 = vector.broadcast %11 : vector<1x128xf32> to vector<16x128xf32>
    %14 = arith.mulf %13, %12 : vector<16x128xf32>
    %15 = arith.addf %10, %14 : vector<16x128xf32>
    %c1 = arith.constant 1 : index
    %c0_13 = arith.constant 0 : index
    %16 = vector.load %arg4[%c1, %c0_13] : memref<4x128xf32, #tpu.memory_space<vmem>>, vector<1x128xf32>
    %c6 = arith.constant 6 : index
    %c0_14 = arith.constant 0 : index
    %17 = vector.load %arg7[%c6, %c0_14] : memref<24x128xf32, #tpu.memory_space<vmem>>, vector<16x128xf32>
    %18 = vector.broadcast %16 : vector<1x128xf32> to vector<16x128xf32>
    %19 = arith.mulf %18, %17 : vector<16x128xf32>
    %20 = arith.addf %15, %19 : vector<16x128xf32>
    %c2 = arith.constant 2 : index
    %c0_15 = arith.constant 0 : index
    %21 = vector.load %arg4[%c2, %c0_15] : memref<4x128xf32, #tpu.memory_space<vmem>>, vector<1x128xf32>
    %c7 = arith.constant 7 : index
    %c0_16 = arith.constant 0 : index
    %22 = vector.load %arg7[%c7, %c0_16] : memref<24x128xf32, #tpu.memory_space<vmem>>, vector<16x128xf32>
    %23 = vector.broadcast %21 : vector<1x128xf32> to vector<16x128xf32>
    %24 = arith.mulf %23, %22 : vector<16x128xf32>
    %25 = arith.addf %20, %24 : vector<16x128xf32>
    %c3 = arith.constant 3 : index
    %c0_17 = arith.constant 0 : index
    %26 = vector.load %arg4[%c3, %c0_17] : memref<4x128xf32, #tpu.memory_space<vmem>>, vector<1x128xf32>
    %c8_18 = arith.constant 8 : index
    %c0_19 = arith.constant 0 : index
    %27 = vector.load %arg7[%c8_18, %c0_19] : memref<24x128xf32, #tpu.memory_space<vmem>>, vector<16x128xf32>
    %28 = vector.broadcast %26 : vector<1x128xf32> to vector<16x128xf32>
    %29 = arith.mulf %28, %27 : vector<16x128xf32>
    %30 = arith.addf %25, %29 : vector<16x128xf32>
    %c0_20 = arith.constant 0 : index
    %c0_21 = arith.constant 0 : index
    %c0_22 = arith.constant 0 : index
    %31 = vector.load %arg6[%c0_20, %c0_21, %c0_22] : memref<1x16x128xf32, #tpu.memory_space<vmem>>, vector<1x16x128xf32>
    %32 = vector.shape_cast %31 : vector<1x16x128xf32> to vector<16x128xf32>
    %33 = vector.shape_cast %30 : vector<16x128xf32> to vector<1x16x128xf32>
    tpu.vector_store %arg6[%c0_20, %c0_21, %c0_22], %33 {strides = array<i32>} : memref<1x16x128xf32, #tpu.memory_space<vmem>>, vector<1x16x128xf32>,
    return
  }
  func.func @transform_0(%arg0: i32, %arg1: i32, %arg2: i32) -> (i32, i32, i32) {
    %c0_i32 = arith.constant 0 : i32
    return %arg0, %arg2, %arg1 : i32, i32, i32
  }
  func.func @transform_1(%arg0: i32, %arg1: i32, %arg2: i32) -> (i32, i32) {
    %c0_i32 = arith.constant 0 : i32
    %c0_i32_0 = arith.constant 0 : i32
    return %c0_i32, %arg1 : i32, i32
  }
  func.func @transform_2(%arg0: i32, %arg1: i32, %arg2: i32) -> (i32, i32) {
    %c0_i32 = arith.constant 0 : i32
    %c0_i32_0 = arith.constant 0 : i32
    return %c0_i32, %arg1 : i32, i32
  }
  func.func @transform_3(%arg0: i32, %arg1: i32, %arg2: i32) -> (i32, i32, i32) {
    %c0_i32 = arith.constant 0 : i32
    return %arg0, %arg2, %arg1 : i32, i32, i32
  }
}

</mosaic_0001>

<bundles_post_ra>
// kernel: causal_conv1d.1
= control target key start
LH: loop header
LB: loop body
LE: loop exit
PB: predicated region body
PF: predicated region fallthrough
CT: control target
= control target key end

     0   :  { %8 = vsyncpa [#allocation5], 0  ;;  %s760_s0 = inlined_call_operand.vmem [shape: f32[2,16,128], index: 0, kind: input, shape index: {}]   ;;  %s761_s1 = inlined_call_operand.vmem [shape: f32[4,128], index: 1, kind: input, shape index: {}]   ;;  %s762_s2 = inlined_call_operand.vmem [shape: f32[1,128], index: 2, kind: input, shape index: {}]   ;;  %s763_s3 = inlined_call_operand.hbm [shape: f32[2,16,128], index: 3, kind: output, shape index: {}]  }
   0x1   :  { %10 = vsyncpa [#allocation5 + $0x1], 0  ;;  %s627_s12 = smov 0   ;;  %s629_s13 = smov 0  }
   0x2   :  { %s631_s14 = smov 0   ;;  %s633_s15 = smov 0  }
   0x3   :  { %s635_s16 = smov 0   ;;  %s637_s17 = smov 0  }
   0x4 LB: > { %s445_s18 = sadd.s32 4294967295, %s601_s17   ;;  %s446_s19 = sadd.s32 4294967294, %s601_s17   ;;  %s601_s17 = sphi %s637_s17, %s16_s17   ;;  %s597_s16 = sphi %s635_s16, %s770_s16   ;;  %s593_s15 = sphi %s633_s15, %s769_s15   ;;  %s589_s14 = sphi %s631_s14, %s768_s14   ;;  %s585_s13 = sphi %s629_s13, %s767_s13   ;;  %s581_s12 = sphi %s627_s12, %s766_s12  }
   0x5   : > { %s35_s20 = sadd.s32 1, %s597_s16  ;;  %s128_s21 = sadd.s32 1, %s589_s14 }
   0x6   : > { %p37_p0 = scmp.ge.s32.totalorder %s35_s20, 2  ;;  %p138_p1 = scmp.ne.s32.totalorder %s589_s14, %s585_s13 }
   0x7   : > { %p139_p2 = scmp.eq.s32.totalorder %s445_s18, 1  ;;  %p144_p3 = scmp.ne.s32.totalorder %s585_s13, %s581_s12 }
   0x8   : > { %s772_s20 = smov (%p37_p0, %s35_s20), 0  ;;  %p145_p5 = scmp.eq.s32.totalorder %s446_s19, 1 }
   0x9   : > { %p667_p4 = por %p139_p2, %p138_p1  ;;  %s121_s23 = ssub.s32 %s597_s16, %s772_s20 }
   0xa   : > { %p451_p6 = scmp.ge.s32.totalorder %s601_s17, 1  ;;  %p126_p7 = scmp.eq.s32.totalorder %s121_s23, 0 }
   0xb   : > { %p674_p8 = por %p145_p5, %p144_p3  ;;  %p192_p9 = scmp.lt.s32.totalorder %s601_s17, 3 }
   0xc   : > { %s680_s25 = scalar_select %p126_p7, %s589_s14, %s128_s21  }
   0xd   : > { %p193_p10 = pnand %p451_p6, %p192_p9 }
   0xe   : > { %p231_p11 = scmp.lt.s32.totalorder (!%p193_p10), %s593_s15, 1  ;;  %s227_s4 = sand.u32 (!%p193_p10), 1, %s585_s13  }
   0xf   : > { %196 = sbr.rel (%p193_p10) target bundleno = 61 (0x3d), region = 32  ;;  %s452_s11 = sshll.u32 (!%p193_p10), %s227_s4, 4 }
  0x10   : > { %s466_s28 = sshll.u32 (!%p193_p10), %s593_s15, 8  ;;  %s715_s6 = scalar_lea.sflag (!%p193_p10), [#allocation5], %s227_s4 }
  0x11   : > { %s711_s5 = scalar_lea.hbm (!%p193_p10), %s763_s3, %s466_s28 }
  0x14   : > { %v603_v0 = vmov 0.0   ;;  %s232_s26 = scalar_select %p231_p11, %s593_s15, 1  ;;  %v456_v4 = vld [vmem:[%s761_s1] ss:$0 sm:$0xff]  ;;  %v457_v5 = vld [vmem:[%s761_s1 + $0x1] ss:$0 sm:$0xff] }
  0x15   : > { %255 = vst [vmem:[#allocation3] sm:$0x7] %v603_v0  ;;  %v455_v6 = vld [vmem:[%s762_s2] ss:$0 sm:$0xff]  ;;  %v458_v11 = vld [vmem:[%s761_s1 + $0x2] ss:$0 sm:$0xff] }
  0x16   : > { %s465_s27 = sshll.u32 %s232_s26, 4  ;;  %v459_v12 = vld [vmem:[%s761_s1 + $0x3] ss:$0 sm:$0xff]  ;;  %s229_s26 = scalar_lea.vmem [#allocation4], %s452_s11 }
  0x17   : > { %s241_s30 = scalar_lea.vmem %s760_s0, %s465_s27  ;;  %s332_s27 = sshll.u32 %s229_s26, 4  ;;  %s706_s27 = int_to_ptr.vmem [resolvable:$true] %s332_s27 }
  0x18   : > { %v258_v1 = vld [vmem:[%s241_s30] sm:$0xff]  ;;  %v259_v2 = vld [vmem:[%s241_s30 + $0x8] sm:$0xff]  ;;  %s525_s7 = scalar_lea.vmem %s706_s27, 256  ;;  %s604_s15 = smov [#allocation4]  }
  0x19   : > { %260 = vst [vmem:[#allocation2 + $0x8] sm:$0xff] %v258_v1  ;;  %261 = vst [vmem:[#allocation2 + $0x10] sm:$0xff] %v259_v2  ;;  %v310_v18 = vmul.f32 %v459_v12, %v259_v2  ;;  %v309_v27 = vmul.f32 %v459_v12, %v258_v1  ;;  %p526_p12 = scmp.ne.s32.totalorder %s706_s27, %s525_s7  ;;  %s529_s8 = sshll.u32 %s604_s15, 4  ;;  %s530_s8 = int_to_ptr.vmem [resolvable:$false] %s529_s8 }
  0x1a   : > { %s531_s9 = scalar_lea.vmem %s530_s8, 512  ;;  %p532_p1 = scmp.lt.s32.totalorder %s706_s27, %s530_s8 }
  0x1b   : > { %p527_p13 = pnand %p526_p12, %p667_p4  ;;  %p533_p2 = scmp.lt.s32.totalorder %s531_s9, %s525_s7 }
  0x1c   : > { %v256_v3 = vld [vmem:[#allocation3] sm:$0x7] }
  0x1d   : > { %257 = vst [vmem:[#allocation2 + $0x5] sm:$0x7] %v256_v3  ;;  %p528_p0 = pneg %p527_p13  ;;  %p534_p3 = por %p533_p2, %p532_p1 }
  0x1f   : > { %p535_p5 = pnand %p534_p3, %p528_p0 }
  0x20   : > { %v271_v7 = vld [vmem:[#allocation2 + $0xd] sm:$0xff] }
  0x21   : > { %v282_v8 = vld [vmem:[#allocation2 + $0xe] sm:$0xff]  ;;  %v277_v9 = vmul.f32 %v456_v4, %v271_v7 }
  0x22   : > { %v288_v10 = vmul.f32 %v457_v5, %v282_v8  ;;  %v293_v13 = vld [vmem:[#allocation2 + $0xf] sm:$0xff] }
  0x23   : > { %v279_v16 = vadd.f32 %v455_v6, %v277_v9  ;;  %v299_v21 = vmul.f32 %v458_v11, %v293_v13 }
  0x24   : > { %v270_v14 = vld [vmem:[#allocation2 + $0x5] sm:$0xff] }
  0x25   : > { %v281_v15 = vld [vmem:[#allocation2 + $0x6] sm:$0xff]  ;;  %v276_v17 = vmul.f32 %v456_v4, %v270_v14  ;;  %v290_v20 = vadd.f32 %v288_v10, %v279_v16 }
  0x26   : > { %v292_v19 = vld [vmem:[#allocation2 + $0x7] sm:$0xff]  ;;  %v287_v23 = vmul.f32 %v457_v5, %v281_v15 }
  0x27   : > { %v278_v22 = vadd.f32 %v455_v6, %v276_v17  ;;  %v301_v24 = vadd.f32 %v299_v21, %v290_v20  ;;  %v298_v26 = vmul.f32 %v458_v11, %v292_v19 }
  0x29   : > { %v289_v25 = vadd.f32 %v287_v23, %v278_v22  ;;  %v312_v28 = vadd.f32 %v310_v18, %v301_v24 }
  0x2b   : > { %v300_v29 = vadd.f32 %v298_v26, %v289_v25  ;;  %314 = vst [vmem:[%s229_s26 + $0x8] sm:$0xff] %v312_v28 }
  0x2d   : > { %v311_v30 = vadd.f32 %v309_v27, %v300_v29 }
  0x2f   : > { %313 = vst [vmem:[%s229_s26] sm:$0xff] %v311_v30 }
  0x30   : > { %538 = shalt.err (!%p535_p5)
}
  0x31   : > { %s539_s4 = scalar_lea.hbm %s711_s5, 256  ;;  %s543_s18 = scalar_lea.hbm %s763_s3, 512 }
  0x32   : > { %p540_p6 = scmp.ne.s32.totalorder %s711_s5, %s539_s4  ;;  %p544_p10 = scmp.lt.s32.totalorder %s711_s5, %s763_s3 }
  0x33   : > { %p545_p11 = scmp.lt.s32.totalorder %s543_s18, %s539_s4 }
  0x34   : > { %p541_p7 = pnand %p540_p6, %p667_p4 }
  0x35   : > { %p546_p12 = por %p545_p11, %p544_p10 }
  0x36   : > { %p542_p9 = pneg %p541_p7 }
  0x38   : > { %p547_p13 = pnand %p546_p12, %p542_p9 }
  0x3a   : > { %550 = shalt.err (!%p547_p13)
}
  0x3b   : > { %s605_s23 = smov 128   ;;  %s606_s26 = smov 8  }
  0x3c   : > { %467 = dma.vmem_to_hbm [thread:$0]  (%p667_p4), %s706_s27, 256, %s711_s5, %s715_s6, %s605_s23, %s605_s23, %s606_s26  }
  0x3d PF: > { %p473_p0 = scmp.ge.s32.totalorder %s601_s17, 2  ;;  %s347_s28 = sand.u32 1, %s581_s12  }
  0x3e   : > { %s348_s29 = scalar_lea.sflag [#allocation5], %s347_s28 }
  0x3f   : > { %p470_p1 = pnand %p473_p0, %p674_p8 }
  0x41   : > { %p471_p2 = pneg %p470_p1 }
  0x43   : > { %576 = dma.done.wait (%p471_p2), %s348_s29, 256  }
  0x44   : > { %578 = vsyncadd (%p471_p2), %s348_s29, 4294967040  ;;  %s16_s17 = sadd.s32 1, %s601_s17   ;;  %s766_s12 = smov %s585_s13 }
  0x45   : > { %p13_p3 = scmp.ge.s32.totalorder %s16_s17, 4   ;;  %s767_s13 = smov %s589_s14 }
  0x46   : > { %s768_s14 = smov %s680_s25  ;;  %s769_s15 = smov %s597_s16 }
  0x47   : > { %s770_s16 = smov %s772_s20  ;;  %15 = sbr.rel (!%p13_p3) target bundleno = 4 (0x4), region = 77 }
  0x4c   :  { %353 = vsyncpa [#allocation5], 1 }
  0x4d   :  { %355 = vsyncpa [#allocation5 + $0x1], 1 }

</bundles_post_ra>
